<compile_context>
chip_gen: v7x
topology: tpu7x:2x2x1
jax: 0.10.0
libtpu: 0.0.40
codegen_flags: <defaults>
</compile_context>

<pallas_src>
import functools

import numpy as np
import jax
import jax.numpy as jnp
from jax import lax
from jax.experimental import pallas as pl
from jax.experimental.pallas import tpu as pltpu


def _round_up(a, m):
    return (a + m - 1) // m * m


def _ln_kernel_packed(m_ref, x_ref, g_ref, b_ref, o_ref, *, inv_c):
    """Packed path: each 128-lane row holds G logical LayerNorm rows of C lanes.

    m_ref : (W, W) block-diagonal ones matrix (W = G*C).  x @ m performs the
            segmented per-group lane sum on the MXU and broadcasts it back to
            every lane of its group, keeping everything 128-lane dense.
    x_ref : (tile, W) packed rows.  g_ref/b_ref: (1, W) per-batch gain/bias,
            tiled G times along lanes (already f32).
    """
    x = x_ref[...].astype(jnp.float32)
    m = m_ref[...]
    mu = jnp.dot(x, m, preferred_element_type=jnp.float32,
                 precision=lax.Precision.HIGHEST) * inv_c
    xc = x - mu
    s = jnp.dot(xc * xc, m, preferred_element_type=jnp.float32,
                precision=lax.Precision.HIGHEST) * inv_c
    # NOTE: exact reproduction of the reference: (x - mu) * (1e-5 + rsqrt(s))
    xn = xc * (1e-05 + lax.rsqrt(s))
    o_ref[...] = (xn * g_ref[...] + b_ref[...]).astype(o_ref.dtype)


def _ln_kernel_rows(x_ref, g_ref, b_ref, o_ref):
    """Plain path (C >= 128 or C doesn't divide 128): one row per sublane row."""
    x = x_ref[...].astype(jnp.float32)
    mu = jnp.mean(x, axis=-1, keepdims=True)
    xc = x - mu
    s = jnp.mean(xc * xc, axis=-1, keepdims=True)
    xn = xc * (1e-05 + lax.rsqrt(s))
    o_ref[...] = (xn * g_ref[...] + b_ref[...]).astype(o_ref.dtype)


def layer_norm_pallas(x, g, b, *, target_block_bytes=1 << 20):
    """x: (B, ..., C) channel-last.  g, b: (B, C) per-batch gain/bias."""
    B = x.shape[0]
    C = x.shape[-1]
    N = int(np.prod(x.shape[1:-1])) if x.ndim > 2 else 1
    dt_bytes = jnp.dtype(x.dtype).itemsize

    # Lane-dense packing factor.
    G = 128 // C if (C < 128 and 128 % C == 0) else 1
    W = G * C
    packed = G > 1

    # Row tile: target ~1 MiB blocks (2x in + 2x out double-buffers ~= 4 MiB,
    # well under the 16 MiB v5e scoped-VMEM default); keep >= ceil(4/B) grid
    # steps along the row axis so both v7x TensorCores stay busy; multiple of 8.
    rows_total = pl.cdiv(N, G)
    tile = max(8, min(target_block_bytes // max(W * dt_bytes, 1), 2048))
    min_steps = max(1, -(-4 // B))
    tile = min(tile, pl.cdiv(rows_total, min_steps))
    tile = max(8, _round_up(tile, 8))

    rows_pad = _round_up(rows_total, tile)
    n_pad = rows_pad * G

    xr = x.reshape(B, N, C)
    if n_pad != N:
        # Tail handling: pad (padded rows normalize to NaN but are sliced off).
        xr = jnp.pad(xr, ((0, 0), (0, n_pad - N), (0, 0)))
    xr = xr.reshape(B, rows_pad, W)

    gr = jnp.tile(g.astype(jnp.float32).reshape(B, 1, C), (1, 1, G))
    br = jnp.tile(b.astype(jnp.float32).reshape(B, 1, C), (1, 1, G))

    grid = (B, rows_pad // tile)

    x_spec = pl.BlockSpec((None, tile, W), lambda i, j: (i, j, 0))
    gb_spec = pl.BlockSpec((None, 1, W), lambda i, j: (i, 0, 0))

    if packed:
        lane = jnp.arange(W, dtype=jnp.int32)
        m = (lane[:, None] // C == lane[None, :] // C).astype(jnp.float32)
        kernel = functools.partial(_ln_kernel_packed, inv_c=1.0 / C)
        in_specs = [pl.BlockSpec((W, W), lambda i, j: (0, 0)),
                    x_spec, gb_spec, gb_spec]
        args = (m, xr, gr, br)
    else:
        kernel = _ln_kernel_rows
        in_specs = [x_spec, gb_spec, gb_spec]
        args = (xr, gr, br)

    cost = pl.CostEstimate(
        flops=int(8 * B * rows_pad * W
                  + (4 * B * rows_pad * W * W if packed else 0)),
        transcendentals=int(B * rows_pad * (W if packed else 1)),
        bytes_accessed=int(2 * B * rows_pad * W * dt_bytes + 2 * B * W * 4
                           + (W * W * 4 if packed else 0)),
    )

    out = pl.pallas_call(
        kernel,
        out_shape=jax.ShapeDtypeStruct((B, rows_pad, W), x.dtype),
        grid_spec=pltpu.PrefetchScalarGridSpec(
            num_scalar_prefetch=0,
            grid=grid,
            in_specs=in_specs,
            out_specs=x_spec,
        ),
        compiler_params=pltpu.CompilerParams(
            dimension_semantics=("parallel", "parallel"),
            vmem_limit_bytes=32 * 1024 * 1024),
        cost_estimate=cost,
    )(*args)

    out = out.reshape(B, n_pad, C)
    if n_pad != N:
        out = out[:, :N, :]
    return out.reshape(x.shape)


class LayerNormPallas:
    """Mirrors videogpt LayerNorm(embd_dim, cond_dim)."""

    def __init__(self, embd_dim, cond_dim, key):
        self.embd_dim = embd_dim
        self.conditional = 'affine_norm' in cond_dim
        if self.conditional:
            (vec_dim,) = cond_dim['affine_norm']
            self.vec_dim = vec_dim
            # nn.Linear(vec_dim, embd_dim, bias=False).weight is (embd, vec);
            # w initialized to constant 1/sqrt(vec_dim); wb default-style init.
            self.w_weight = jnp.full((embd_dim, vec_dim),
                                     1.0 / np.sqrt(vec_dim), dtype=jnp.float32)
            bound = 1.0 / np.sqrt(vec_dim)
            self.wb_weight = jax.random.uniform(
                key, (embd_dim, vec_dim), jnp.float32, -bound, bound)
        else:
            self.g = jnp.ones((embd_dim,), jnp.float32)
            self.b = jnp.zeros((embd_dim,), jnp.float32)

    def __call__(self, x, cond):
        B = x.shape[0]
        if self.conditional:
            v = cond['affine_norm']                      # (B, vec_dim)
            g = 1.0 + v @ self.w_weight.T                # (B, embd_dim)
            b = v @ self.wb_weight.T                     # (B, embd_dim)
        else:
            g = jnp.broadcast_to(self.g, (B, self.embd_dim))
            b = jnp.broadcast_to(self.b, (B, self.embd_dim))
        return layer_norm_pallas(x, g, b)


def _reference(x, g, b):
    xf = x.astype(jnp.float32)
    mu = xf.mean(axis=-1, keepdims=True)
    s = jnp.square(xf - mu).mean(axis=-1, keepdims=True)
    xf = (xf - mu) * (1e-05 + lax.rsqrt(s))
    gb = g.reshape(x.shape[0], *([1] * (x.ndim - 2)), x.shape[-1])
    bb = b.reshape(x.shape[0], *([1] * (x.ndim - 2)), x.shape[-1])
    return (xf * gb + bb).astype(x.dtype)


if __name__ == "__main__":
    B, T, S, C = 2, 8, 16, 32      # embd_dim = 32
    vec_dim = 16

    key = jax.random.PRNGKey(0)
    kx, kc, kw, kx2, kx3 = jax.random.split(key, 5)
    x = jax.random.normal(kx, (B, T, S, C), dtype=jnp.float32)
    cond_vec = jax.random.normal(kc, (B, vec_dim), dtype=jnp.float32)

    # --- conditional branch (packed lane-dense path, C=32 -> G=4) ---
    ln_cond = LayerNormPallas(C, {'affine_norm': (vec_dim,)}, kw)
    y_cond = ln_cond(x, {'affine_norm': cond_vec})
    jax.block_until_ready(y_cond)
    g_ref = 1.0 + cond_vec @ ln_cond.w_weight.T
    b_ref = cond_vec @ ln_cond.wb_weight.T
    np.testing.assert_allclose(np.asarray(y_cond),
                               np.asarray(_reference(x, g_ref, b_ref)),
                               rtol=1e-5, atol=1e-5)

    # --- unconditional branch ---
    ln_plain = LayerNormPallas(C, {}, kw)
    y_plain = ln_plain(x, {})
    jax.block_until_ready(y_plain)
    np.testing.assert_allclose(
        np.asarray(y_plain),
        np.asarray(_reference(x,
                              jnp.broadcast_to(ln_plain.g, (B, C)),
                              jnp.broadcast_to(ln_plain.b, (B, C)))),
        rtol=1e-5, atol=1e-5)

    # --- non-divisible middle dims (exercises padded tail path) ---
    x_odd = jax.random.normal(kx2, (2, 7, 5, C), dtype=jnp.float32)
    y_odd = layer_norm_pallas(x_odd,
                              jnp.broadcast_to(ln_plain.g, (2, C)),
                              jnp.broadcast_to(ln_plain.b, (2, C)))
    jax.block_until_ready(y_odd)
    np.testing.assert_allclose(
        np.asarray(y_odd),
        np.asarray(_reference(x_odd,
                              jnp.broadcast_to(ln_plain.g, (2, C)),
                              jnp.broadcast_to(ln_plain.b, (2, C)))),
        rtol=1e-5, atol=1e-5)

    # --- C multiple of 128 (exercises plain lane-dense rows path) ---
    C2 = 128
    x_big = jax.random.normal(kx3, (2, 4, 8, C2), dtype=jnp.float32)
    g2 = jnp.ones((2, C2), jnp.float32)
    b2 = jnp.zeros((2, C2), jnp.float32)
    y_big = layer_norm_pallas(x_big, g2, b2)
    jax.block_until_ready(y_big)
    np.testing.assert_allclose(np.asarray(y_big),
                               np.asarray(_reference(x_big, g2, b2)),
                               rtol=1e-5, atol=1e-5)

    print("KERNEL_OK")
</pallas_src>

<mosaic_0001>
module attributes {stable_mosaic.version = 11 : i64} {
  func.func @_ln_kernel_packed(%arg0: i32, %arg1: i32, %arg2: memref<128x128xf32, #tpu.memory_space<vmem>>, %arg3: memref<1x16x128xf32, #tpu.memory_space<vmem>>, %arg4: memref<1x1x128xf32, #tpu.memory_space<vmem>>, %arg5: memref<1x1x128xf32, #tpu.memory_space<vmem>>, %arg6: memref<1x16x128xf32, #tpu.memory_space<vmem>>) attributes {dimension_semantics = [#tpu.dimension_semantics<parallel>, #tpu.dimension_semantics<parallel>], iteration_bounds = array<i64: 2, 2>, scalar_prefetch = 0 : i64, scratch_operands = 0 : i64, tpu.core_type = #tpu.core_type<tc>, window_params = [{pipeline_mode = #tpu.pipeline_mode<synchronous>, transform_indices = @transform_0, window_bounds = array<i64: 128, 128>}, {transform_indices = @transform_1, window_bounds = array<i64: 1, 16, 128>}, {transform_indices = @transform_2, window_bounds = array<i64: 1, 1, 128>}, {transform_indices = @transform_3, window_bounds = array<i64: 1, 1, 128>}, {transform_indices = @transform_4, window_bounds = array<i64: 1, 16, 128>}]} {
    %c0 = arith.constant 0 : index
    %c0_0 = arith.constant 0 : index
    %c0_1 = arith.constant 0 : index
    %0 = vector.load %arg3[%c0, %c0_0, %c0_1] : memref<1x16x128xf32, #tpu.memory_space<vmem>>, vector<1x16x128xf32>
    %1 = vector.shape_cast %0 : vector<1x16x128xf32> to vector<16x128xf32>
    %c0_2 = arith.constant 0 : index
    %c0_3 = arith.constant 0 : index
    %2 = vector.load %arg2[%c0_2, %c0_3] : memref<128x128xf32, #tpu.memory_space<vmem>>, vector<128x128xf32>
    %cst = arith.constant dense<0.000000e+00> : vector<16x128xf32>
    %3 = tpu.matmul %1, %2, %cst {dimension_numbers = #tpu.dot_dimension_numbers<[1], [0], [0], [1], [0, 0, 1, 1], [], []>, precision = #tpu.contract_precision<fp32>} : vector<16x128xf32>, vector<128x128xf32>, vector<16x128xf32> -> vector<16x128xf32>
    %cst_4 = arith.constant 3.125000e-02 : f32
    %4 = vector.broadcast %cst_4 : f32 to vector<16x128xf32>
    %5 = arith.mulf %3, %4 : vector<16x128xf32>
    %6 = arith.subf %1, %5 : vector<16x128xf32>
    %7 = arith.mulf %6, %6 : vector<16x128xf32>
    %cst_5 = arith.constant dense<0.000000e+00> : vector<16x128xf32>
    %8 = tpu.matmul %7, %2, %cst_5 {dimension_numbers = #tpu.dot_dimension_numbers<[1], [0], [0], [1], [0, 0, 1, 1], [], []>, precision = #tpu.contract_precision<fp32>} : vector<16x128xf32>, vector<128x128xf32>, vector<16x128xf32> -> vector<16x128xf32>
    %cst_6 = arith.constant 3.125000e-02 : f32
    %9 = vector.broadcast %cst_6 : f32 to vector<16x128xf32>
    %10 = arith.mulf %8, %9 : vector<16x128xf32>
    %11 = math.rsqrt %10 : vector<16x128xf32>
    %cst_7 = arith.constant 9.99999974E-6 : f32
    %12 = vector.broadcast %cst_7 : f32 to vector<16x128xf32>
    %13 = arith.addf %12, %11 : vector<16x128xf32>
    %14 = arith.mulf %6, %13 : vector<16x128xf32>
    %c0_8 = arith.constant 0 : index
    %c0_9 = arith.constant 0 : index
    %c0_10 = arith.constant 0 : index
    %15 = vector.load %arg4[%c0_8, %c0_9, %c0_10] : memref<1x1x128xf32, #tpu.memory_space<vmem>>, vector<1x1x128xf32>
    %16 = vector.shape_cast %15 : vector<1x1x128xf32> to vector<1x128xf32>
    %17 = vector.broadcast %16 : vector<1x128xf32> to vector<16x128xf32>
    %18 = arith.mulf %14, %17 : vector<16x128xf32>
    %c0_11 = arith.constant 0 : index
    %c0_12 = arith.constant 0 : index
    %c0_13 = arith.constant 0 : index
    %19 = vector.load %arg5[%c0_11, %c0_12, %c0_13] : memref<1x1x128xf32, #tpu.memory_space<vmem>>, vector<1x1x128xf32>
    %20 = vector.shape_cast %19 : vector<1x1x128xf32> to vector<1x128xf32>
    %21 = vector.broadcast %20 : vector<1x128xf32> to vector<16x128xf32>
    %22 = arith.addf %18, %21 : vector<16x128xf32>
    %c0_14 = arith.constant 0 : index
    %c0_15 = arith.constant 0 : index
    %c0_16 = arith.constant 0 : index
    %23 = vector.load %arg6[%c0_14, %c0_15, %c0_16] : memref<1x16x128xf32, #tpu.memory_space<vmem>>, vector<1x16x128xf32>
    %24 = vector.shape_cast %23 : vector<1x16x128xf32> to vector<16x128xf32>
    %25 = vector.shape_cast %22 : vector<16x128xf32> to vector<1x16x128xf32>
    tpu.vector_store %arg6[%c0_14, %c0_15, %c0_16], %25 {strides = array<i32>} : memref<1x16x128xf32, #tpu.memory_space<vmem>>, vector<1x16x128xf32>,
    return
  }
  func.func @transform_0(%arg0: i32, %arg1: i32) -> (i32, i32) {
    %c0_i32 = arith.constant 0 : i32
    %c0_i32_0 = arith.constant 0 : i32
    %c0_i32_1 = arith.constant 0 : i32
    return %c0_i32, %c0_i32_0 : i32, i32
  }
  func.func @transform_1(%arg0: i32, %arg1: i32) -> (i32, i32, i32) {
    %c0_i32 = arith.constant 0 : i32
    %c0_i32_0 = arith.constant 0 : i32
    return %arg0, %arg1, %c0_i32 : i32, i32, i32
  }
  func.func @transform_2(%arg0: i32, %arg1: i32) -> (i32, i32, i32) {
    %c0_i32 = arith.constant 0 : i32
    %c0_i32_0 = arith.constant 0 : i32
    %c0_i32_1 = arith.constant 0 : i32
    return %arg0, %c0_i32, %c0_i32_0 : i32, i32, i32
  }
  func.func @transform_3(%arg0: i32, %arg1: i32) -> (i32, i32, i32) {
    %c0_i32 = arith.constant 0 : i32
    %c0_i32_0 = arith.constant 0 : i32
    %c0_i32_1 = arith.constant 0 : i32
    return %arg0, %c0_i32, %c0_i32_0 : i32, i32, i32
  }
  func.func @transform_4(%arg0: i32, %arg1: i32) -> (i32, i32, i32) {
    %c0_i32 = arith.constant 0 : i32
    %c0_i32_0 = arith.constant 0 : i32
    return %arg0, %arg1, %c0_i32 : i32, i32, i32
  }
}

</mosaic_0001>

<bundles_post_ra>
// kernel: tpu_custom_call.1
= control target key start
LH: loop header
LB: loop body
LE: loop exit
PB: predicated region body
PF: predicated region fallthrough
CT: control target
= control target key end

     0   :  { %s3891_s0 = inlined_call_operand.hbm [shape: f32[128,128], index: 0, kind: input, shape index: {}]   ;;  %s3892_s1 = inlined_call_operand.hbm [shape: f32[2,32,128], index: 1, kind: input, shape index: {}]   ;;  %s3893_s2 = inlined_call_operand.vmem [shape: f32[2,1,128], index: 2, kind: input, shape index: {}]   ;;  %s3894_s3 = inlined_call_operand.vmem [shape: f32[2,1,128], index: 3, kind: input, shape index: {}]   ;;  %s3895_s4 = inlined_call_operand.hbm [shape: f32[2,32,128], index: 4, kind: output, shape index: {}]  }
   0x1   :  { %3907 = sst [smem:[#allocation16_spill]] %s3891_s0 }
   0x2   :  { %9 = vsyncpa [#allocation3], 0 }
   0x3   :  { %10 = vsyncpa [#allocation6], 0 }
   0x4   :  { %12 = vsyncpa [#allocation6 + $0x1], 0 }
   0x5   :  { %13 = vsyncpa [#allocation4], 0 }
   0x6   :  { %15 = vsyncpa [#allocation4 + $0x1], 0  ;;  %s3187_s15 = smov 0   ;;  %s3189_s16 = smov 0  }
   0x7   :  { %s3191_s17 = smov 0   ;;  %s3193_s18 = smov 0  }
   0x8   :  { %s3195_s19 = smov 0   ;;  %s3197_s20 = smov 0  }
   0x9   :  { %s3199_s21 = smov 0   ;;  %s3201_s22 = smov 0  }
   0xa LB: > { %3908 = sst [smem:[#allocation11_spill]] %s3125_s15  ;;  %s1835_s23 = sadd.s32 4294967295, %s3153_s22   ;;  %s3153_s22 = sphi %s3201_s22, %s21_s22   ;;  %s3149_s21 = sphi %s3199_s21, %s3939_s21   ;;  %s3145_s20 = sphi %s3197_s20, %s3933_s20   ;;  %s3141_s19 = sphi %s3195_s19, %s3938_s19   ;;  %s3137_s18 = sphi %s3193_s18, %s3932_s18   ;;  %s3133_s17 = sphi %s3191_s17, %s3937_s17   ;;  %s3129_s16 = sphi %s3189_s16, %s3936_s16   ;;  %s3125_s15 = sphi %s3187_s15, %s3935_s15  }
   0xb   : > { %3909 = sst [smem:[#allocation12_spill]] %s3145_s20  ;;  %s1836_s24 = sadd.s32 4294967294, %s3153_s22  }
   0xc   : > { %p76_p0 = scmp.ne.s32.totalorder %s3129_s16, %s3125_s15  ;;  %p3231_p1 = scmp.eq.s32.totalorder %s1835_s23, 0 }
   0xd   : > { %p3235_p2 = scmp.eq.s32.totalorder %s1835_s23, 3  ;;  %p160_p3 = scmp.eq.s32.totalorder %s1836_s24, 3 }
   0xe   : > { %s3910_s25 = scalar_select %p3231_p1, 1, 0 }
   0xf   : > { %s3911_s26 = scalar_select %p3235_p2, 1, 0 }
  0x10   : > { %p3241_p4 = por %p3231_p1, %p76_p0  ;;  %p1837_p5 = scmp.ge.s32.totalorder %s3153_s22, 1 }
  0x11   : > { %p3246_p6 = por %p160_p3, %p76_p0  ;;  %p167_p7 = scmp.lt.s32.totalorder %s3153_s22, 5 }
  0x12   : > { %s3912_s27 = scalar_select %p3241_p4, 1, 0 }
  0x13   : > { %s3913_s28 = scalar_select %p3246_p6, 1, 0 }
  0x14   : > { %p3251_p8 = pnand %p1837_p5, %p167_p7  ;;  %s3155_s30 = smov [#allocation2]  }
  0x15   : > { %3914 = sst [smem:[#allocation13_spill]] %s3913_s28  ;;  %s179_s5 = sshll.u32 %s3155_s30, 4  ;;  %s180_s5 = int_to_ptr.vmem [resolvable:$true] %s179_s5 }
  0x16   : > { %s3915_s29 = scalar_select %p3251_p8, 1, 0 }
  0x17   : > { %p2904_p9 = pneg %p3251_p8  ;;  %s3917_s0 = sld [smem:[#allocation16_spill]] }
  0x19   : > { %p3259_p10 = pnand %p2904_p9, %p3231_p1 }
  0x1b   : > { %p2995_p12 = pneg %p3259_p10 }
  0x1d   : > { %s2993_s9 = scalar_lea.hbm %s3917_s0, 2048 }
  0x1e   : > { %p2994_p11 = scmp.ne.s32.totalorder %s3917_s0, %s2993_s9  ;;  %p3000_p3 = scmp.lt.u32.totalorder %s2993_s9, %s3917_s0 }
  0x20   : > { %p2996_p13 = pnand %p2995_p12, %p2994_p11 }
  0x22   : > { %p2997_p0 = pneg %p2996_p13 }
  0x24   : > { %p3002_p5 = pnand %p3000_p3, %p2997_p0 }
  0x26   : > { %3005 = shalt.err (!%p3002_p5)
}
  0x27   : > { %s3006_s14 = scalar_lea.vmem %s180_s5, 2048  ;;  %p3014_p4 = scmp.lt.s32.totalorder %s180_s5, %s180_s5 }
  0x28   : > { %p3007_p7 = scmp.ne.s32.totalorder %s180_s5, %s3006_s14  ;;  %p3015_p1 = scmp.lt.s32.totalorder %s3006_s14, %s3006_s14 }
  0x2a   : > { %p3009_p9 = pnand %p3007_p7, %p2995_p12  ;;  %p3016_p8 = por %p3015_p1, %p3014_p4 }
  0x2c   : > { %p3010_p6 = pneg %p3009_p9 }
  0x2e   : > { %p3017_p2 = pnand %p3016_p8, %p3010_p6 }
  0x30   : > { %3020 = shalt.err (!%p3017_p2)
}
  0x31   : > { %s3900_s23 = smov 128   ;;  %s3901_s24 = smov 8  }
  0x32   : > { %2907 = dma.hbm_to_vmem [thread:$0]  (!%p3259_p10), %s3917_s0, 2048, %s180_s5, [#allocation3], %s3900_s23, %s3900_s23, %s3901_s24  }
  0x33   : > { %s30_s8 = sadd.s32 1, %s3145_s20  ;;  %s33_s9 = sadd.s32 1, %s3149_s21 }
  0x34   : > { %p31_p1 = scmp.ge.s32.totalorder %s30_s8, 2  ;;  %s63_s10 = sadd.s32 1, %s3133_s17 }
  0x35   : > { %p70_p2 = scmp.ne.s32.totalorder %s3133_s17, %s3129_s16  ;;  %p71_p4 = scmp.eq.s32.totalorder %s3153_s22, 0 }
  0x36   : > { %s3941_s8 = smov (%p31_p1, %s30_s8), 0  ;;  %s3943_s9 = smov (!%p31_p1, %s33_s9), %s3149_s21 }
  0x37   : > { %3918 = sst [smem:[#allocation14_spill]] %s3941_s8  ;;  %s59_s6 = ssub.s32 %s3145_s20, %s3941_s8 }
  0x38   : > { %p35_p6 = scmp.ge.s32.totalorder %s3943_s9, 2  ;;  %p3919_p8 = scmp.ne.s32.totalorder %s3911_s26, 0 }
  0x39   : > { %p3299_p10 = por %p71_p4, %p70_p2  ;;  %p2917_p12 = scmp.lt.s32.totalorder %s3153_s22, 4 }
  0x3a   : > { %p3295_p11 = por %p3919_p8, %p70_p2  ;;  %s3945_s9 = smov (%p35_p6, %s3943_s9), 0 }
  0x3b   : > { %3922 = sst [smem:[#allocation15_spill]] %s3945_s9  ;;  %s193_s12 = sand.u32 1, %s3133_s17  }
  0x3c   : > { %s1841_s13 = sshll.u32 %s3145_s20, 1  ;;  %s58_s14 = ssub.s32 %s3149_s21, %s3945_s9 }
  0x3d   : > { %s60_s30 = sor.u32 %s59_s6, %s58_s14  ;;  %s1840_s7 = sshll.u32 %s193_s12, 4 }
  0x3e   : > { %p61_p13 = scmp.eq.s32.totalorder %s60_s30, 0  ;;  %s1842_s26 = sshll.u32 %s3149_s21, 2 }
  0x3f   : > { %s197_s23 = scalar_lea.vmem [#allocation5], %s1840_s7  ;;  %s203_s8 = sadd.s32 %s1842_s26, %s1841_s13 }
  0x40   : > { %s206_s24 = sshll.u32 %s197_s23, 4  ;;  %s1843_s28 = sshll.u32 %s203_s8, 7  ;;  %s3314_s24 = int_to_ptr.vmem [resolvable:$true] %s206_s24 }
  0x41   : > { %s3312_s0 = scalar_select %p61_p13, %s3133_s17, %s63_s10  }
  0x42   : > { %p3320_p0 = pnand %p2917_p12, %p3299_p10  ;;  %s3327_s6 = scalar_lea.hbm %s3892_s1, %s1843_s28 }
  0x43   : > { %s3329_s23 = scalar_lea.sflag [#allocation6], %s193_s12  ;;  %s3021_s8 = scalar_lea.hbm %s3327_s6, 256 }
  0x44   : > { %p3022_p3 = scmp.ne.s32.totalorder %s3327_s6, %s3021_s8  ;;  %p3023_p5 = pneg %p3320_p0 }
  0x45   : > { %s3026_s9 = scalar_lea.hbm %s3892_s1, 1024  ;;  %p3027_p1 = scmp.lt.u32.totalorder %s3327_s6, %s3892_s1 }
  0x46   : > { %p3024_p7 = pnand %p3023_p5, %p3022_p3  ;;  %p3028_p2 = scmp.lt.u32.totalorder %s3026_s9, %s3021_s8 }
  0x47   : > { %p3030_p6 = scmp.lt.u32.totalorder %s3021_s8, %s3327_s6 }
  0x48   : > { %p3025_p9 = pneg %p3024_p7  ;;  %p3029_p4 = por %p3028_p2, %p3027_p1 }
  0x4a   : > { %p3031_p8 = por %p3030_p6, %p3029_p4 }
  0x4c   : > { %p3032_p10 = pnand %p3031_p8, %p3025_p9 }
  0x4e   : > { %3035 = shalt.err (!%p3032_p10)
}
  0x4f   : > { %s3036_s12 = scalar_lea.vmem %s3314_s24, 256  ;;  %s3158_s13 = smov [#allocation5]  }
  0x50   : > { %p3037_p12 = scmp.ne.s32.totalorder %s3314_s24, %s3036_s12  ;;  %s3041_s14 = sshll.u32 %s3158_s13, 4  ;;  %s3042_s14 = int_to_ptr.vmem [resolvable:$false] %s3041_s14 }
  0x51   : > { %s3043_s30 = scalar_lea.vmem %s3042_s14, 512  ;;  %p3044_p7 = scmp.lt.s32.totalorder %s3314_s24, %s3042_s14 }
  0x52   : > { %p3039_p13 = pnand %p3037_p12, %p3023_p5  ;;  %p3045_p1 = scmp.lt.s32.totalorder %s3043_s30, %s3036_s12 }
  0x54   : > { %p3040_p3 = pneg %p3039_p13  ;;  %p3046_p2 = por %p3045_p1, %p3044_p7 }
  0x56   : > { %p3047_p4 = pnand %p3046_p2, %p3040_p3 }
  0x58   : > { %3050 = shalt.err (!%p3047_p4)
}
  0x59   : > { %s3924_s7 = smov 8   ;;  %s3925_s26 = smov 128  }
  0x5a   : > { %2911 = dma.hbm_to_vmem [thread:$0]  (!%p3320_p0), %s3327_s6, 256, %s3314_s24, %s3329_s23, %s3925_s26, %s3925_s26, %s3924_s7  }
  0x5b   : > { %p3926_p5 = scmp.ne.s32.totalorder %s3915_s29, 0 }
  0x5c   : > { %p3927_p9 = scmp.ne.s32.totalorder (!%p3926_p5), %s3910_s25, 0 }
  0x5d   : > { %230 = sbr.rel (%p3926_p5) target bundleno = 941 (0x3ad), region = 36 }
  0x64   : > { %3112 = dma.done.wait (%p3927_p9), [#allocation3], 2048  }
  0x65   : > { %3114 = vsyncadd (%p3927_p9), [#allocation3], 4294965248  ;;  %s3367_s8 = sand.u32 1, %s3129_s16   ;;  %p3928_p0 = scmp.ne.s32.totalorder %s3912_s27, 0 }
  0x66   : > { %s1846_s15 = sshll.u32 %s3367_s8, 4  ;;  %s237_s10 = scalar_lea.sflag [#allocation6], %s3367_s8 }
  0x67   : > { %s3373_s24 = scalar_lea.vmem [#allocation5], %s1846_s15 }
  0x68   : > { %3116 = dma.done.wait (%p3928_p0), %s237_s10, 256  }
  0x69   : > { %3118 = vsyncadd (%p3928_p0), %s237_s10, 4294967040  ;;  %v281_v0 = vld [vmem:[#allocation2] sm:$0xff]  ;;  %v282_v1 = vld [vmem:[#allocation2 + $0x8] sm:$0xff]  ;;  %p272_p6 = scmp.lt.s32.totalorder %s3141_s19, 1  ;;  %s1851_s27 = sshll.u32 %s3137_s18, 1 }
  0x6a   : > { %v283_v2 = vld [vmem:[#allocation2 + $0x10] sm:$0xff]  ;;  %v298_v3 = vand.u32 4294901760, %v281_v0  ;;  %v301_v4 = vand.u32 4294901760, %v282_v1  ;;  %v284_v5 = vld [vmem:[#allocation2 + $0x18] sm:$0xff]  ;;  %v285_v7 = vld [vmem:[#allocation2 + $0x20] sm:$0xff]  ;;  %s1852_s29 = sshll.u32 %s3141_s19, 2 }
  0x6b   : > { %v304_v6 = vand.u32 4294901760, %v283_v2  ;;  %v3379_v8 = vld [vmem:[#allocation2 + $0x28] sm:$0xff]  ;;  %v307_v9 = vand.u32 4294901760, %v284_v5  ;;  %v310_v11 = vand.u32 4294901760, %v285_v7  ;;  %v3386_v14 = vld [vmem:[#allocation2 + $0x30] sm:$0xff]  ;;  %v3388_v15 = vld [vmem:[#allocation2 + $0x38] sm:$0xff]  ;;  %s1712_s12 = sadd.s32 %s1852_s29, %s1851_s27 }
  0x6c   : > { %v3381_v10 = vpack.c.bf16 %v301_v4, %v298_v3  ;;  %v313_v12 = vand.u32 4294901760, %v3379_v8  ;;  %v3392_v16 = vld [vmem:[%s3373_s24] sm:$0xff]  ;;  %v316_v19 = vand.u32 4294901760, %v3386_v14  ;;  %v319_v20 = vand.u32 4294901760, %v3388_v15  ;;  %v3407_v22 = vld [vmem:[#allocation2 + $0x48] sm:$0xff]  ;;  %v292_v32 = vld [vmem:[#allocation2 + $0x58] sm:$0xff] }
  0x6d   : > { %v3384_v13 = vpack.c.bf16 %v307_v9, %v304_v6  ;;  %v3397_v17 = vand.u32 4294901760, %v3392_v16  ;;  %v3405_v21 = vld [vmem:[#allocation2 + $0x40] sm:$0xff]  ;;  %v3416_v25 = vsub.f32 %v281_v0, %v298_v3  ;;  %v3418_v26 = vsub.f32 %v282_v1, %v301_v4  ;;  %v3421_v27 = vld [vmem:[%s3373_s24 + $0x8] sm:$0xff]  ;;  %v291_v31 = vld [vmem:[#allocation2 + $0x50] sm:$0xff]  ;;  %s273_s25 = scalar_select %p272_p6, %s3141_s19, 1 }
  0x6e   : > { %2493 = vmatprep.subr.bf16.mxu0 %v3381_v10  ;;  %2685 = vmatprep.subr.bf16.mxu1 %v3381_v10  ;;  %v3401_v18 = vpack.c.bf16 %v313_v12, %v310_v11  ;;  %v3429_v28 = vpack.c.bf16 %v319_v20, %v316_v19  ;;  %v322_v29 = vand.u32 4294901760, %v3405_v21  ;;  %v325_v30 = vand.u32 4294901760, %v3407_v22  ;;  %v293_v33 = vld [vmem:[#allocation2 + $0x60] sm:$0xff]  ;;  %v294_v35 = vld [vmem:[#allocation2 + $0x68] sm:$0xff]  ;;  %v295_v36 = vld [vmem:[#allocation2 + $0x70] sm:$0xff]  ;;  %s1853_s18 = sshll.u32 %s1712_s12, 7 }
  0x6f   : > { %2495 = vmatpush3.bf16.msra.mxu0 %v3381_v10  ;;  %2687 = vmatpush3.bf16.msra.mxu1 %v3381_v10  ;;  %v3411_v23 = vsub.f32 %v3392_v16, %v3397_v17  ;;  %v296_v37 = vld [vmem:[#allocation2 + $0x78] sm:$0xff]  ;;  %v3438_v38 = vand.u32 4294901760, %v3421_v27  ;;  %v3440_v39 = vsub.f32 %v283_v2, %v304_v6  ;;  %v401_v41 = vand.u32 4294901760, %v3416_v25  ;;  %s274_s20 = scalar_lea.vmem %s3893_s2, %s273_s25  ;;  %s277_s5 = scalar_lea.vmem %s3894_s3, %s273_s25 }
  0x70   : > { %2497 = vmatprep.subr.bf16.mxu0 %v3384_v13  ;;  %2689 = vmatprep.subr.bf16.mxu1 %v3384_v13  ;;  %v408_v42 = vand.u32 4294901760, %v3418_v26  ;;  %v3447_v43 = vpack.c.bf16 %v325_v30, %v322_v29  ;;  %v328_v44 = vand.u32 4294901760, %v291_v31  ;;  %v331_v45 = vand.u32 4294901760, %v292_v32  ;;  %s270_s19 = scalar_lea.vmem [#allocation7], %s1846_s15  ;;  %s3835_s7 = scalar_lea.hbm %s3895_s4, %s1853_s18 }
  0x71   : > { %v380_v24 = vand.u32 4294901760, %v3411_v23  ;;  %v334_v46 = vand.u32 4294901760, %v293_v33  ;;  %v337_v47 = vand.u32 4294901760, %v294_v35  ;;  %v340_v48 = vand.u32 4294901760, %v295_v36  ;;  %s1715_s13 = sshll.u32 %s270_s19, 4  ;;  %s1700_s26 = scalar_lea.sflag [#allocation4], %s3367_s8  ;;  %s3837_s13 = int_to_ptr.vmem [resolvable:$true] %s1715_s13 }
  0x72   : > { %v343_v49 = vand.u32 4294901760, %v296_v37  ;;  %v3452_v50 = vsub.f32 %v3421_v27, %v3438_v38  ;;  %v415_v51 = vand.u32 4294901760, %v3440_v39  ;;  %v3455_v52 = vsub.f32 %v284_v5, %v307_v9  ;;  %s3051_s10 = scalar_lea.vmem %s3837_s13, 256  ;;  %s3159_s15 = smov [#allocation7]  }
  0x73   : > { %2499 = vmatpush3.bf16.msra.mxu0 %v3384_v13  ;;  %2691 = vmatpush3.bf16.msra.mxu1 %v3384_v13  ;;  %v381_v34 = vsub.f32 %v3411_v23, %v380_v24  ;;  %v3457_v53 = vsub.f32 %v285_v7, %v310_v11  ;;  %v402_v54 = vsub.f32 %v3416_v25, %v401_v41  ;;  %p3052_p8 = scmp.ne.s32.totalorder %s3837_s13, %s3051_s10  ;;  %s3055_s24 = sshll.u32 %s3159_s15, 4  ;;  %s3056_s24 = int_to_ptr.vmem [resolvable:$false] %s3055_s24 }
  0x74   : > { %2501 = vmatprep.subr.bf16.mxu0 %v3401_v18  ;;  %2693 = vmatprep.subr.bf16.mxu1 %v3401_v18  ;;  %v409_v55 = vsub.f32 %v3418_v26, %v408_v42  ;;  %v3467_v56 = vsub.f32 %v3379_v8, %v313_v12  ;;  %v3471_v57 = vpack.c.bf16 %v331_v45, %v328_v44  ;;  %v390_v60 = vand.u32 4294901760, %v3452_v50  ;;  %s3057_s25 = scalar_lea.vmem %s3056_s24, 512  ;;  %p3058_p13 = scmp.lt.s32.totalorder %s3837_s13, %s3056_s24 }
  0x75   : > { %v382_v40 = vand.u32 4294901760, %v381_v34  ;;  %v3474_v58 = vpack.c.bf16 %v337_v47, %v334_v46  ;;  %v3476_v59 = vpack.c.bf16 %v343_v49, %v340_v48  ;;  %v416_v61 = vsub.f32 %v3440_v39, %v415_v51  ;;  %p3053_p10 = pnand %p3052_p8, %p3295_p11  ;;  %p3059_p3 = scmp.lt.s32.totalorder %s3057_s25, %s3051_s10 }
  0x76   : > { %v422_v62 = vand.u32 4294901760, %v3455_v52  ;;  %v429_v63 = vand.u32 4294901760, %v3457_v53  ;;  %v403_v0 = vand.u32 4294901760, %v402_v54  ;;  %v410_v1 = vand.u32 4294901760, %v409_v55 }
  0x77   : > { %2503 = vmatpush3.bf16.msra.mxu0 %v3401_v18  ;;  %2695 = vmatpush3.bf16.msra.mxu1 %v3401_v18  ;;  %v436_v2 = vand.u32 4294901760, %v3467_v56  ;;  %v3487_v3 = vsub.f32 %v3386_v14, %v316_v19  ;;  %v3494_v4 = vsub.f32 %v3388_v15, %v319_v20  ;;  %v3497_v5 = vsub.f32 %v3405_v21, %v322_v29  ;;  %p3054_p12 = pneg %p3053_p10  ;;  %p3060_p7 = por %p3059_p3, %p3058_p13 }
  0x78   : > { %2505 = vmatprep.subr.bf16.mxu0 %v3429_v28  ;;  %2697 = vmatprep.subr.bf16.mxu1 %v3429_v28  ;;  %v3500_v6 = vsub.f32 %v3407_v22, %v325_v30  ;;  %v3503_v7 = vsub.f32 %v291_v31, %v328_v44  ;;  %v3505_v8 = vsub.f32 %v292_v32, %v331_v45 }
  0x79   : > { %2104 = vmatprep.mubr.f32.mxu0 %v382_v40  ;;  %v3507_v9 = vsub.f32 %v293_v33, %v334_v46  ;;  %v3509_v11 = vsub.f32 %v294_v35, %v337_v47  ;;  %v423_v12 = vsub.f32 %v3455_v52, %v422_v62  ;;  %v430_v14 = vsub.f32 %v3457_v53, %v429_v63  ;;  %p3061_p1 = pnand %p3060_p7, %p3054_p12 }
  0x7a   : > { %v3513_v15 = vsub.f32 %v295_v36, %v340_v48  ;;  %v3515_v19 = vsub.f32 %v296_v37, %v343_v49  ;;  %v3518_v20 = vpack.c.bf16 %v410_v1, %v403_v0  ;;  %v391_v21 = vsub.f32 %v3452_v50, %v390_v60 }
  0x7b   : > { %2507 = vmatpush3.bf16.msra.mxu0 %v3429_v28  ;;  %2699 = vmatpush3.bf16.msra.mxu1 %v3429_v28  ;;  %v437_v22 = vsub.f32 %v3467_v56, %v436_v2  ;;  %v443_v29 = vand.u32 4294901760, %v3487_v3  ;;  %v450_v30 = vand.u32 4294901760, %v3494_v4  ;;  %v457_v31 = vand.u32 4294901760, %v3497_v5 }
  0x7c   : > { %2509 = vmatprep.subr.bf16.mxu0 %v3447_v43  ;;  %2701 = vmatprep.subr.bf16.mxu1 %v3447_v43  ;;  %v464_v32 = vand.u32 4294901760, %v3500_v6  ;;  %v471_v33 = vand.u32 4294901760, %v3503_v7  ;;  %v478_v34 = vand.u32 4294901760, %v3505_v8  ;;  %v485_v35 = vand.u32 4294901760, %v3507_v9 }
  0x7d   : > { %v492_v36 = vand.u32 4294901760, %v3509_v11  ;;  %v499_v37 = vand.u32 4294901760, %v3513_v15  ;;  %v506_v40 = vand.u32 4294901760, %v3515_v19  ;;  %v3541_v44 = vpack.c.bf16 %v408_v42, %v401_v41 }
  0x7e   : > { %v3543_v45 = vpack.c.bf16 %v422_v62, %v415_v51  ;;  %v417_v46 = vand.u32 4294901760, %v416_v61  ;;  %v3546_v47 = vpack.c.bf16 %v436_v2, %v429_v63  ;;  %v3548_v48 = vpack.c.bf16 %v450_v30, %v443_v29 }
  0x7f   : > { %2511 = vmatpush3.bf16.msra.mxu0 %v3447_v43  ;;  %2703 = vmatpush3.bf16.msra.mxu1 %v3447_v43  ;;  %v3550_v49 = vpack.c.bf16 %v464_v32, %v457_v31  ;;  %v424_v54 = vand.u32 4294901760, %v423_v12  ;;  %v3554_v55 = vpack.c.bf16 %v478_v34, %v471_v33  ;;  %v3556_v41 = vpack.c.bf16 %v492_v36, %v485_v35 }
  0x80   : > { %2513 = vmatprep.subr.bf16.mxu0 %v3471_v57  ;;  %2705 = vmatprep.subr.bf16.mxu1 %v3471_v57  ;;  %v3558_v42 = vpack.c.bf16 %v506_v40, %v499_v37  ;;  %v392_v51 = vand.u32 4294901760, %v391_v21  ;;  %v431_v61 = vand.u32 4294901760, %v430_v14  ;;  %v438_v62 = vand.u32 4294901760, %v437_v22 }
  0x81   : > { %v3564_v63 = vpack.c.bf16 %v424_v54, %v417_v46  ;;  %v444_v0 = vsub.f32 %v3487_v3, %v443_v29  ;;  %v451_v1 = vsub.f32 %v3494_v4, %v450_v30  ;;  %v458_v21 = vsub.f32 %v3497_v5, %v457_v31 }
  0x82   : > { %v3570_v2 = vpack.c.bf16 %v438_v62, %v431_v61  ;;  %v465_v22 = vsub.f32 %v3500_v6, %v464_v32  ;;  %v472_v29 = vsub.f32 %v3503_v7, %v471_v33  ;;  %v486_v61 = vsub.f32 %v3507_v9, %v485_v35 }
  0x83   : > { %2515 = vmatpush3.bf16.msra.mxu0 %v3471_v57  ;;  %2707 = vmatpush3.bf16.msra.mxu1 %v3471_v57  ;;  %v445_v12 = vand.u32 4294901760, %v444_v0  ;;  %v452_v14 = vand.u32 4294901760, %v451_v1  ;;  %v459_v46 = vand.u32 4294901760, %v458_v21  ;;  %v493_v33 = vsub.f32 %v3509_v11, %v492_v36 }
  0x84   : > { %2517 = vmatprep.subr.bf16.mxu0 %v3474_v58  ;;  %2709 = vmatprep.subr.bf16.mxu1 %v3474_v58  ;;  %v466_v54 = vand.u32 4294901760, %v465_v22  ;;  %v473_v32 = vand.u32 4294901760, %v472_v29  ;;  %v487_v0 = vand.u32 4294901760, %v486_v61  ;;  %v507_v35 = vsub.f32 %v3515_v19, %v506_v40 }
  0x85   : > { %v3579_v30 = vpack.c.bf16 %v452_v14, %v445_v12  ;;  %v500_v12 = vsub.f32 %v3513_v15, %v499_v37  ;;  %v3606_v37 = vpack.c.bf16 %v3418_v26, %v3416_v25  ;;  %v3612_v40 = vpack.c.bf16 %v3455_v52, %v3440_v39 }
  0x86   : > { %v3585_v31 = vpack.c.bf16 %v466_v54, %v459_v46  ;;  %v508_v36 = vand.u32 4294901760, %v507_v35  ;;  %v3620_v25 = vpack.c.bf16 %v3467_v56, %v3457_v53  ;;  %v3626_v26 = vpack.c.bf16 %v3494_v4, %v3487_v3 }
  0x87   : > { %2519 = vmatpush3.bf16.msra.mxu0 %v3474_v58  ;;  %2711 = vmatpush3.bf16.msra.mxu1 %v3474_v58  ;;  %v501_v21 = vand.u32 4294901760, %v500_v12  ;;  %v3632_v39 = vpack.c.bf16 %v3500_v6, %v3497_v5  ;;  %v3638_v52 = vpack.c.bf16 %v3505_v8, %v3503_v7  ;;  %v3644_v53 = vpack.c.bf16 %v3509_v11, %v3507_v9 }
  0x88   : > { %2521 = vmatprep.subr.bf16.mxu0 %v3476_v59  ;;  %2713 = vmatprep.subr.bf16.mxu1 %v3476_v59  ;;  %v3650_v56 = vpack.c.bf16 %v3515_v19, %v3513_v15 }
  0x89   : > { %v3600_v22 = vpack.c.bf16 %v508_v36, %v501_v21 }
  0x8b   : > { %2523 = vmatpush3.bf16.msra.mxu0 %v3476_v59  ;;  %2715 = vmatpush3.bf16.msra.mxu1 %v3476_v59 }
  0x8c   : > { %2525 = vmatprep.subr.bf16.mxu0 %v3518_v20  ;;  %2717 = vmatprep.subr.bf16.mxu1 %v3518_v20 }
  0x8e   : > { %2105 = vmatmul.mubr.f32.vlgmr.msra.gmra.mrb[0].mxu0 %v392_v51  ;;  %v479_v51 = vsub.f32 %v3505_v8, %v478_v34  ;;  %v494_v34 = vand.u32 4294901760, %v493_v33 }
  0x8f   : > { %2527 = vmatpush3.bf16.msra.mxu0 %v3518_v20  ;;  %2139 = vmatprep.mubr.f32.mxu0 %v3397_v17 }
  0x90   : > { %2529 = vmatprep.subr.bf16.mxu0 %v3564_v63  ;;  %v480_v62 = vand.u32 4294901760, %v479_v51  ;;  %v3596_v14 = vpack.c.bf16 %v494_v34, %v487_v0 }
  0x92   : > { %v3590_v1 = vpack.c.bf16 %v480_v62, %v473_v32 }
  0x93   : > { %2531 = vmatpush3.bf16.msra.mxu0 %v3564_v63 }
  0x94   : > { %2533 = vmatprep.subr.bf16.mxu0 %v3570_v2 }
  0x97   : > { %2535 = vmatpush3.bf16.msra.mxu0 %v3570_v2 }
  0x98   : > { %2537 = vmatprep.subr.bf16.mxu0 %v3579_v30 }
  0x9b   : > { %2539 = vmatpush3.bf16.msra.mxu0 %v3579_v30 }
  0x9c   : > { %2541 = vmatprep.subr.bf16.mxu0 %v3585_v31 }
  0x9f   : > { %2543 = vmatpush3.bf16.msra.mxu0 %v3585_v31 }
  0xa0   : > { %2545 = vmatprep.subr.bf16.mxu0 %v3590_v1 }
  0xa3   : > { %2547 = vmatpush3.bf16.msra.mxu0 %v3590_v1 }
  0xa4   : > { %2549 = vmatprep.subr.bf16.mxu0 %v3596_v14 }
  0xa7   : > { %2551 = vmatpush3.bf16.msra.mxu0 %v3596_v14 }
  0xa8   : > { %2553 = vmatprep.subr.bf16.mxu0 %v3600_v22 }
  0xab   : > { %2555 = vmatpush3.bf16.msra.mxu0 %v3600_v22 }
  0xac   : > { %2557 = vmatprep.subr.bf16.mxu0 %v3606_v37 }
  0xae   : > { %2140 = vmatmul.mubr.f32.vlgmr.msra.gmra.mrb[0].mxu0 %v3438_v38 }
  0xaf   : > { %2559 = vmatpush3.bf16.msra.mxu0 %v3606_v37  ;;  %2174 = vmatprep.mubr.f32.mxu0 %v3411_v23 }
  0xb0   : > { %2561 = vmatprep.subr.bf16.mxu0 %v3612_v40 }
  0xb3   : > { %2563 = vmatpush3.bf16.msra.mxu0 %v3612_v40 }
  0xb4   : > { %2565 = vmatprep.subr.bf16.mxu0 %v3620_v25 }
  0xb7   : > { %2567 = vmatpush3.bf16.msra.mxu0 %v3620_v25 }
  0xb8   : > { %2569 = vmatprep.subr.bf16.mxu0 %v3626_v26 }
  0xbb   : > { %2571 = vmatpush3.bf16.msra.mxu0 %v3626_v26 }
  0xbc   : > { %2573 = vmatprep.subr.bf16.mxu0 %v3632_v39 }
  0xbf   : > { %2575 = vmatpush3.bf16.msra.mxu0 %v3632_v39 }
  0xc0   : > { %2577 = vmatprep.subr.bf16.mxu0 %v3638_v52 }
  0xc3   : > { %2579 = vmatpush3.bf16.msra.mxu0 %v3638_v52 }
  0xc4   : > { %2581 = vmatprep.subr.bf16.mxu0 %v3644_v53 }
  0xc7   : > { %2583 = vmatpush3.bf16.msra.mxu0 %v3644_v53 }
  0xc8   : > { %2585 = vmatprep.subr.bf16.mxu0 %v3650_v56 }
  0xcb   : > { %2587 = vmatpush3.bf16.msra.mxu0 %v3650_v56 }
  0xcc   : > { %2589 = vmatprep.subr.bf16.mxu0 %v3381_v10 }
  0xce   : > { %2175 = vmatmul.mubr.f32.vlgmr.msra.gmra.mrb[0].mxu0 %v3452_v50 }
  0xcf   : > { %2591 = vmatpush3.bf16.msra.mxu0 %v3381_v10  ;;  %2209 = vmatprep.mubr.f32.mxu0 %v380_v24 }
  0xd0   : > { %2593 = vmatprep.subr.bf16.mxu0 %v3384_v13 }
  0xd3   : > { %2595 = vmatpush3.bf16.msra.mxu0 %v3384_v13 }
  0xd4   : > { %2597 = vmatprep.subr.bf16.mxu0 %v3401_v18 }
  0xd7   : > { %2599 = vmatpush3.bf16.msra.mxu0 %v3401_v18 }
  0xd8   : > { %2601 = vmatprep.subr.bf16.mxu0 %v3429_v28 }
  0xdb   : > { %2603 = vmatpush3.bf16.msra.mxu0 %v3429_v28 }
  0xdc   : > { %2605 = vmatprep.subr.bf16.mxu0 %v3447_v43 }
  0xdf   : > { %2607 = vmatpush3.bf16.msra.mxu0 %v3447_v43 }
  0xe0   : > { %2609 = vmatprep.subr.bf16.mxu0 %v3471_v57 }
  0xe3   : > { %2611 = vmatpush3.bf16.msra.mxu0 %v3471_v57 }
  0xe4   : > { %2613 = vmatprep.subr.bf16.mxu0 %v3474_v58 }
  0xe7   : > { %2615 = vmatpush3.bf16.msra.mxu0 %v3474_v58 }
  0xe8   : > { %2617 = vmatprep.subr.bf16.mxu0 %v3476_v59 }
  0xeb   : > { %2619 = vmatpush3.bf16.msra.mxu0 %v3476_v59 }
  0xec   : > { %2621 = vmatprep.subr.bf16.mxu0 %v3541_v44 }
  0xee   : > { %2210 = vmatmul.mubr.f32.vlgmr.msra.gmra.mrb[0].mxu0 %v390_v60 }
  0xef   : > { %2623 = vmatpush3.bf16.msra.mxu0 %v3541_v44  ;;  %2244 = vmatprep.mubr.f32.mxu0 %v3397_v17 }
  0xf0   : > { %2625 = vmatprep.subr.bf16.mxu0 %v3543_v45 }
  0xf3   : > { %2627 = vmatpush3.bf16.msra.mxu0 %v3543_v45 }
  0xf4   : > { %2629 = vmatprep.subr.bf16.mxu0 %v3546_v47 }
  0xf7   : > { %2631 = vmatpush3.bf16.msra.mxu0 %v3546_v47 }
  0xf8   : > { %2633 = vmatprep.subr.bf16.mxu0 %v3548_v48 }
  0xfb   : > { %2635 = vmatpush3.bf16.msra.mxu0 %v3548_v48 }
  0xfc   : > { %2637 = vmatprep.subr.bf16.mxu0 %v3550_v49 }
  0xff   : > { %2639 = vmatpush3.bf16.msra.mxu0 %v3550_v49 }
 0x100   : > { %2641 = vmatprep.subr.bf16.mxu0 %v3554_v55 }
 0x103   : > { %2643 = vmatpush3.bf16.msra.mxu0 %v3554_v55 }
 0x104   : > { %2645 = vmatprep.subr.bf16.mxu0 %v3556_v41 }
 0x107   : > { %2647 = vmatpush3.bf16.msra.mxu0 %v3556_v41 }
 0x108   : > { %2649 = vmatprep.subr.bf16.mxu0 %v3558_v42 }
 0x10b   : > { %2651 = vmatpush3.bf16.msra.mxu0 %v3558_v42 }
 0x10c   : > { %2653 = vmatprep.subr.bf16.mxu0 %v3381_v10 }
 0x10e   : > { %2245 = vmatmul.mubr.f32.vlgmr.msra.gmra.mrb[0].mxu0 %v3438_v38 }
 0x10f   : > { %2655 = vmatpush3.bf16.msra.mxu0 %v3381_v10  ;;  %2279 = vmatprep.mubr.f32.mxu0 %v3397_v17 }
 0x110   : > { %2657 = vmatprep.subr.bf16.mxu0 %v3384_v13 }
 0x113   : > { %2659 = vmatpush3.bf16.msra.mxu0 %v3384_v13 }
 0x114   : > { %2661 = vmatprep.subr.bf16.mxu0 %v3401_v18 }
 0x117   : > { %2663 = vmatpush3.bf16.msra.mxu0 %v3401_v18 }
 0x118   : > { %2665 = vmatprep.subr.bf16.mxu0 %v3429_v28 }
 0x11b   : > { %2667 = vmatpush3.bf16.msra.mxu0 %v3429_v28 }
 0x11c   : > { %2669 = vmatprep.subr.bf16.mxu0 %v3447_v43 }
 0x11f   : > { %2671 = vmatpush3.bf16.msra.mxu0 %v3447_v43 }
 0x120   : > { %2673 = vmatprep.subr.bf16.mxu0 %v3471_v57 }
 0x123   : > { %2675 = vmatpush3.bf16.msra.mxu0 %v3471_v57 }
 0x124   : > { %2677 = vmatprep.subr.bf16.mxu0 %v3474_v58 }
 0x127   : > { %2679 = vmatpush3.bf16.msra.mxu0 %v3474_v58 }
 0x128   : > { %2681 = vmatprep.subr.bf16.mxu0 %v3476_v59 }
 0x12b   : > { %2683 = vmatpush3.bf16.msra.mxu0 %v3476_v59 }
 0x12e   : > { %2280 = vmatmul.mubr.f32.vlgmr.msra.gmra.mrb[0].mxu0 %v3438_v38 }
 0x201   : > { %v2281_v17 = vpop.f32.mrb[0].mxu0 }
 0x202   : > { %v982_v23 = vmul.f32 0.03125, %v2281_v17  ;;  %v971_v24 = vpop.f32.mrb[1].mxu0 }
 0x203   : > { %v981_v50 = vmul.f32 0.03125, %v971_v24 }
 0x204   : > { %v3713_v60 = vsub.f32 %v3421_v27, %v982_v23 }
 0x205   : > { %v3716_v3 = vsub.f32 %v3392_v16, %v981_v50 }
 0x206   : > { %v986_v4 = vmul.f32 %v3713_v60, %v3713_v60 }
 0x207   : > { %v985_v5 = vmul.f32 %v3716_v3, %v3716_v3 }
 0x208   : > { %v3722_v6 = vand.u32 4294901760, %v986_v4 }
 0x209   : > { %v3724_v7 = vand.u32 4294901760, %v985_v5 }
 0x20a   : > { %v3727_v38 = vsub.f32 %v986_v4, %v3722_v6 }
 0x20b   : > { %v1069_v8 = vsub.f32 %v985_v5, %v3724_v7 }
 0x20c   : > { %v1080_v27 = vand.u32 4294901760, %v3727_v38 }
 0x20d   : > { %v1070_v9 = vand.u32 4294901760, %v1069_v8 }
 0x20e   : > { %v1081_v16 = vsub.f32 %v3727_v38, %v1080_v27 }
 0x20f   : > { %v1071_v11 = vsub.f32 %v1069_v8, %v1070_v9 }
 0x210   : > { %v1082_v19 = vand.u32 4294901760, %v1081_v16 }
 0x211   : > { %v1072_v15 = vand.u32 4294901760, %v1071_v11 }
 0x213   : > { %2314 = vmatprep.mubr.f32.mxu1 %v1072_v15 }
 0x214   : > { %2315 = vmatmul.mubr.f32.vlgmr.msra.gmra.mrb[0].mxu1 %v1082_v19 }
 0x215   : > { %2719 = vmatpush3.bf16.msra.mxu1 %v3518_v20  ;;  %2349 = vmatprep.mubr.f32.mxu1 %v3724_v7 }
 0x216   : > { %2721 = vmatprep.subr.bf16.mxu1 %v3564_v63 }
 0x219   : > { %2723 = vmatpush3.bf16.msra.mxu1 %v3564_v63 }
 0x21a   : > { %2725 = vmatprep.subr.bf16.mxu1 %v3570_v2 }
 0x21d   : > { %2727 = vmatpush3.bf16.msra.mxu1 %v3570_v2 }
 0x21e   : > { %2729 = vmatprep.subr.bf16.mxu1 %v3579_v30 }
 0x221   : > { %2731 = vmatpush3.bf16.msra.mxu1 %v3579_v30 }
 0x222   : > { %2733 = vmatprep.subr.bf16.mxu1 %v3585_v31 }
 0x225   : > { %2735 = vmatpush3.bf16.msra.mxu1 %v3585_v31 }
 0x226   : > { %2737 = vmatprep.subr.bf16.mxu1 %v3590_v1 }
 0x229   : > { %2739 = vmatpush3.bf16.msra.mxu1 %v3590_v1 }
 0x22a   : > { %2741 = vmatprep.subr.bf16.mxu1 %v3596_v14 }
 0x22d   : > { %2743 = vmatpush3.bf16.msra.mxu1 %v3596_v14 }
 0x22e   : > { %2745 = vmatprep.subr.bf16.mxu1 %v3600_v22 }
 0x231   : > { %2747 = vmatpush3.bf16.msra.mxu1 %v3600_v22 }
 0x232   : > { %2749 = vmatprep.subr.bf16.mxu1 %v3606_v37 }
 0x234   : > { %2350 = vmatmul.mubr.f32.vlgmr.msra.gmra.mrb[0].mxu1 %v3722_v6 }
 0x235   : > { %2751 = vmatpush3.bf16.msra.mxu1 %v3606_v37  ;;  %2384 = vmatprep.mubr.f32.mxu1 %v1069_v8 }
 0x236   : > { %2753 = vmatprep.subr.bf16.mxu1 %v3612_v40 }
 0x239   : > { %2755 = vmatpush3.bf16.msra.mxu1 %v3612_v40 }
 0x23a   : > { %2757 = vmatprep.subr.bf16.mxu1 %v3620_v25 }
 0x23d   : > { %2759 = vmatpush3.bf16.msra.mxu1 %v3620_v25 }
 0x23e   : > { %2761 = vmatprep.subr.bf16.mxu1 %v3626_v26 }
 0x241   : > { %2763 = vmatpush3.bf16.msra.mxu1 %v3626_v26 }
 0x242   : > { %2765 = vmatprep.subr.bf16.mxu1 %v3632_v39 }
 0x245   : > { %2767 = vmatpush3.bf16.msra.mxu1 %v3632_v39 }
 0x246   : > { %2769 = vmatprep.subr.bf16.mxu1 %v3638_v52 }
 0x249   : > { %2771 = vmatpush3.bf16.msra.mxu1 %v3638_v52 }
 0x24a   : > { %2773 = vmatprep.subr.bf16.mxu1 %v3644_v53 }
 0x24d   : > { %2775 = vmatpush3.bf16.msra.mxu1 %v3644_v53 }
 0x24e   : > { %2777 = vmatprep.subr.bf16.mxu1 %v3650_v56 }
 0x251   : > { %2779 = vmatpush3.bf16.msra.mxu1 %v3650_v56 }
 0x252   : > { %2781 = vmatprep.subr.bf16.mxu1 %v3381_v10 }
 0x254   : > { %2385 = vmatmul.mubr.f32.vlgmr.msra.gmra.mrb[0].mxu1 %v3727_v38 }
 0x255   : > { %2783 = vmatpush3.bf16.msra.mxu1 %v3381_v10  ;;  %2419 = vmatprep.mubr.f32.mxu1 %v1070_v9 }
 0x256   : > { %2785 = vmatprep.subr.bf16.mxu1 %v3384_v13 }
 0x259   : > { %2787 = vmatpush3.bf16.msra.mxu1 %v3384_v13 }
 0x25a   : > { %2789 = vmatprep.subr.bf16.mxu1 %v3401_v18 }
 0x25d   : > { %2791 = vmatpush3.bf16.msra.mxu1 %v3401_v18 }
 0x25e   : > { %2793 = vmatprep.subr.bf16.mxu1 %v3429_v28 }
 0x261   : > { %2795 = vmatpush3.bf16.msra.mxu1 %v3429_v28 }
 0x262   : > { %2797 = vmatprep.subr.bf16.mxu1 %v3447_v43 }
 0x265   : > { %2799 = vmatpush3.bf16.msra.mxu1 %v3447_v43 }
 0x266   : > { %2801 = vmatprep.subr.bf16.mxu1 %v3471_v57 }
 0x269   : > { %2803 = vmatpush3.bf16.msra.mxu1 %v3471_v57 }
 0x26a   : > { %2805 = vmatprep.subr.bf16.mxu1 %v3474_v58 }
 0x26d   : > { %2807 = vmatpush3.bf16.msra.mxu1 %v3474_v58 }
 0x26e   : > { %2809 = vmatprep.subr.bf16.mxu1 %v3476_v59 }
 0x271   : > { %2811 = vmatpush3.bf16.msra.mxu1 %v3476_v59 }
 0x272   : > { %2813 = vmatprep.subr.bf16.mxu1 %v3541_v44 }
 0x274   : > { %2420 = vmatmul.mubr.f32.vlgmr.msra.gmra.mrb[0].mxu1 %v1080_v27 }
 0x275   : > { %2815 = vmatpush3.bf16.msra.mxu1 %v3541_v44  ;;  %2454 = vmatprep.mubr.f32.mxu1 %v3724_v7 }
 0x276   : > { %2817 = vmatprep.subr.bf16.mxu1 %v3543_v45 }
 0x279   : > { %2819 = vmatpush3.bf16.msra.mxu1 %v3543_v45  ;;  %v1849_v45 = vld [vmem:[%s277_s5] ss:$0 sm:$0xff] }
 0x27a   : > { %2821 = vmatprep.subr.bf16.mxu1 %v3546_v47 }
 0x27d   : > { %2823 = vmatpush3.bf16.msra.mxu1 %v3546_v47 }
 0x27e   : > { %2825 = vmatprep.subr.bf16.mxu1 %v3548_v48 }
 0x281   : > { %2827 = vmatpush3.bf16.msra.mxu1 %v3548_v48 }
 0x282   : > { %2829 = vmatprep.subr.bf16.mxu1 %v3550_v49 }
 0x285   : > { %2831 = vmatpush3.bf16.msra.mxu1 %v3550_v49 }
 0x286   : > { %2833 = vmatprep.subr.bf16.mxu1 %v3554_v55 }
 0x289   : > { %2835 = vmatpush3.bf16.msra.mxu1 %v3554_v55 }
 0x28a   : > { %2837 = vmatprep.subr.bf16.mxu1 %v3556_v41 }
 0x28d   : > { %2839 = vmatpush3.bf16.msra.mxu1 %v3556_v41 }
 0x28e   : > { %2841 = vmatprep.subr.bf16.mxu1 %v3558_v42 }
 0x291   : > { %2843 = vmatpush3.bf16.msra.mxu1 %v3558_v42 }
 0x292   : > { %2845 = vmatprep.subr.bf16.mxu1 %v3381_v10 }
 0x294   : > { %2455 = vmatmul.mubr.f32.vlgmr.msra.gmra.mrb[0].mxu1 %v3722_v6 }
 0x295   : > { %2847 = vmatpush3.bf16.msra.mxu1 %v3381_v10  ;;  %2489 = vmatprep.mubr.f32.mxu1 %v3724_v7 }
 0x296   : > { %2849 = vmatprep.subr.bf16.mxu1 %v3384_v13 }
 0x299   : > { %2851 = vmatpush3.bf16.msra.mxu1 %v3384_v13 }
 0x29a   : > { %2853 = vmatprep.subr.bf16.mxu1 %v3401_v18 }
 0x29d   : > { %2855 = vmatpush3.bf16.msra.mxu1 %v3401_v18 }
 0x29e   : > { %2857 = vmatprep.subr.bf16.mxu1 %v3429_v28 }
 0x2a1   : > { %2859 = vmatpush3.bf16.msra.mxu1 %v3429_v28 }
 0x2a2   : > { %2861 = vmatprep.subr.bf16.mxu1 %v3447_v43 }
 0x2a5   : > { %2863 = vmatpush3.bf16.msra.mxu1 %v3447_v43 }
 0x2a6   : > { %2865 = vmatprep.subr.bf16.mxu1 %v3471_v57 }
 0x2a9   : > { %2867 = vmatpush3.bf16.msra.mxu1 %v3471_v57 }
 0x2aa   : > { %2869 = vmatprep.subr.bf16.mxu1 %v3474_v58 }
 0x2ad   : > { %2871 = vmatpush3.bf16.msra.mxu1 %v3474_v58 }
 0x2ae   : > { %2873 = vmatprep.subr.bf16.mxu1 %v3476_v59 }
 0x2b1   : > { %2875 = vmatpush3.bf16.msra.mxu1 %v3476_v59  ;;  %v1848_v59 = vld [vmem:[%s274_s20] ss:$0 sm:$0xff] }
 0x2b4   : > { %2490 = vmatmul.mubr.f32.vlgmr.msra.gmra.mrb[0].mxu1 %v3722_v6 }
 0x387   : > { %v2491_v10 = vpop.f32.mrb[0].mxu1 }
 0x388   : > { %v1672_v13 = vmul.f32 0.03125, %v2491_v10  ;;  %v1661_v18 = vpop.f32.mrb[1].mxu1 }
 0x389   : > { %v1671_v28 = vmul.f32 0.03125, %v1661_v18 }
 0x38a   : > { %2989 = vrsqrt.f32 %v1672_v13 }
 0x38b   : > { %2991 = vrsqrt.f32 %v1671_v28 }
 0x394   : > { %v2990_v43 = vpop.eup %2989 }
 0x395   : > { %v2992_v57 = vpop.eup %2991  ;;  %v1676_v58 = vadd.f32 1e-05, %v2990_v43 }
 0x396   : > { %v1675_v20 = vadd.f32 1e-05, %v2992_v57 }
 0x397   : > { %v1678_v44 = vmul.f32 %v1676_v58, %v3713_v60 }
 0x398   : > { %v1677_v47 = vmul.f32 %v1675_v20, %v3716_v3 }
 0x399   : > { %v1687_v48 = vmul.f32 %v1848_v59, %v1678_v44 }
 0x39a   : > { %v1686_v49 = vmul.f32 %v1848_v59, %v1677_v47 }
 0x39b   : > { %v1696_v55 = vadd.f32 %v1849_v45, %v1687_v48 }
 0x39c   : > { %v1695_v41 = vadd.f32 %v1849_v45, %v1686_v49 }
 0x39d   : > { %1698 = vst [vmem:[%s270_s19 + $0x8] sm:$0xff] %v1696_v55 }
 0x39e   : > { %1697 = vst [vmem:[%s270_s19] sm:$0xff] %v1695_v41 }
 0x39f   : > { %3064 = shalt.err (!%p3061_p1)
}
 0x3a0   : > { %s3065_s27 = scalar_lea.hbm %s3835_s7, 256  ;;  %s3069_s23 = scalar_lea.hbm %s3895_s4, 1024 }
 0x3a1   : > { %p3066_p2 = scmp.ne.s32.totalorder %s3835_s7, %s3065_s27  ;;  %p3070_p9 = scmp.lt.u32.totalorder %s3835_s7, %s3895_s4 }
 0x3a2   : > { %p3071_p0 = scmp.lt.u32.totalorder %s3069_s23, %s3065_s27  ;;  %p3073_p8 = scmp.lt.u32.totalorder %s3065_s27, %s3835_s7 }
 0x3a3   : > { %p3067_p4 = pnand %p3066_p2, %p3295_p11 }
 0x3a4   : > { %p3072_p6 = por %p3071_p0, %p3070_p9 }
 0x3a5   : > { %p3068_p5 = pneg %p3067_p4 }
 0x3a6   : > { %p3074_p10 = por %p3073_p8, %p3072_p6 }
 0x3a8   : > { %p3075_p12 = pnand %p3074_p10, %p3068_p5 }
 0x3aa   : > { %3078 = shalt.err (!%p3075_p12)
}
 0x3ab   : > { %s3160_s28 = smov 128   ;;  %s3161_s5 = smov 8  }
 0x3ac   : > { %2902 = dma.vmem_to_hbm [thread:$0]  (%p3295_p11), %s3837_s13, 256, %s3835_s7, %s1700_s26, %s3160_s28, %s3160_s28, %s3161_s5  }
 0x3ad PF: > { %s3929_s12 = sld [smem:[#allocation11_spill]]  ;;  %s3930_s18 = sld [smem:[#allocation13_spill]] }
 0x3ae   : > { %p2919_p13 = scmp.ge.s32.totalorder %s3153_s22, 2 }
 0x3b3   : > { %s1730_s19 = sand.u32 1, %s3929_s12   ;;  %p3931_p3 = scmp.ne.s32.totalorder %s3930_s18, 0 }
 0x3b4   : > { %s1731_s14 = scalar_lea.sflag [#allocation4], %s1730_s19 }
 0x3b5   : > { %p2913_p7 = pnand %p2919_p13, %p3931_p3 }
 0x3b7   : > { %3120 = dma.done.wait (!%p2913_p7), %s1731_s14, 256  }
 0x3b8   : > { %3122 = vsyncadd (!%p2913_p7), %s1731_s14, 4294967040  ;;  %s21_s22 = sadd.s32 1, %s3153_s22   ;;  %s3932_s18 = sld [smem:[#allocation12_spill]] }
 0x3b9   : > { %p18_p1 = scmp.ge.s32.totalorder %s21_s22, 6   ;;  %s3933_s20 = sld [smem:[#allocation14_spill]] }
 0x3ba   : > { %s3934_s11 = sld [smem:[#allocation15_spill]]  ;;  %s3935_s15 = smov %s3129_s16 }
 0x3bb   : > { %s3936_s16 = smov %s3133_s17  ;;  %s3937_s17 = smov %s3312_s0 }
 0x3bc   : > { %s3938_s19 = smov %s3149_s21  ;;  %20 = sbr.rel (!%p18_p1) target bundleno = 10 (0xa), region = 92 }
 0x3c0   : > { %s3939_s21 = smov %s3934_s11 }
 0x3c3   :  { %1736 = vsyncpa [#allocation3], 1 }
 0x3c4   :  { %1738 = vsyncpa [#allocation3 + $0x1], 1 }
 0x3c5   :  { %1739 = vsyncpa [#allocation6], 1 }
 0x3c6   :  { %1741 = vsyncpa [#allocation6 + $0x1], 1 }
 0x3c7   :  { %1742 = vsyncpa [#allocation4], 1 }
 0x3c8   :  { %1744 = vsyncpa [#allocation4 + $0x1], 1 }

</bundles_post_ra>
